<compile_context>
chip_gen: v7x
topology: tpu7x:2x2x1
jax: 0.10.0
libtpu: 0.0.40
codegen_flags: <defaults>
</compile_context>

<pallas_src>
import jax
import jax.numpy as jnp
from jax.experimental import pallas as pl
from jax.experimental.pallas import tpu as pltpu


def _round_up(x, m):
    return (x + m - 1) // m * m


def merge_layer_kernel(x1_ref, x2_ref, w1a_ref, w1b_ref, b1_ref, w2_ref, b2_ref, o_ref):
    # x1_ref: [tm, d1p]      x2_ref: [tm, d2p]
    # w1a_ref: [d1p, dhp]    w1b_ref: [d2p, dhp]   b1_ref: [1, dhp]
    # w2_ref:  [dhp, dop]    b2_ref:  [1, dop]     o_ref:  [tm, dop]
    #
    # h = relu(concat(x1, x2) @ W1^T + b1) == relu(x1 @ w1a + x2 @ w1b + b1)
    h = jnp.dot(x1_ref[...], w1a_ref[...], preferred_element_type=jnp.float32)
    h = h + jnp.dot(x2_ref[...], w1b_ref[...], preferred_element_type=jnp.float32)
    h = jnp.maximum(h + b1_ref[...], 0.0)  # f32 epilogue (v5e-friendly), cast once at store
    out = jnp.dot(h, w2_ref[...], preferred_element_type=jnp.float32) + b2_ref[...]
    o_ref[...] = out.astype(o_ref.dtype)


def merge_layer(x1, x2, w1, b1, w2, b2, *, tm_target=512):
    """Computes fc2(relu(fc1(concat([x1, x2], axis=1)))) with pre-transposed weights.

    w1: [dim1+dim2, dim3] (= fc1.weight.T), b1: [dim3]
    w2: [dim3, dim4]      (= fc2.weight.T), b2: [dim4]
    """
    N, d1 = x1.shape
    n2, d2 = x2.shape
    assert N == n2, "x1/x2 row counts must match"
    din = d1 + d2
    dh = w1.shape[1]
    dout = w2.shape[1]
    assert w1.shape[0] == din and w2.shape[0] == dh

    # Lane-dense padding: every feature dim -> multiple of 128.
    d1p, d2p = _round_up(d1, 128), _round_up(d2, 128)
    dhp, dop = _round_up(dh, 128), _round_up(dout, 128)

    # Row tile: large to amortize per-grid-step overhead; tm_target=512 is a
    # multiple of 256 (v6e/v7x MXU) and 128 (v5e). Small N -> single tile.
    if N <= tm_target:
        tm = _round_up(N, 8)
        n_pad = tm
    else:
        tm = tm_target
        n_pad = _round_up(N, tm)

    dtype = x1.dtype
    x1p = jnp.pad(x1, ((0, n_pad - N), (0, d1p - d1)))
    x2p = jnp.pad(x2, ((0, n_pad - N), (0, d2p - d2)))
    # Split fc1's weight so the concat never has to be materialized in HBM.
    w1a = jnp.pad(w1[:d1, :], ((0, d1p - d1), (0, dhp - dh)))
    w1b = jnp.pad(w1[d1:, :], ((0, d2p - d2), (0, dhp - dh)))
    b1p = jnp.pad(b1.reshape(1, -1), ((0, 0), (0, dhp - dh)))
    w2p = jnp.pad(w2, ((0, dhp - dh), (0, dop - dout)))
    b2p = jnp.pad(b2.reshape(1, -1), ((0, 0), (0, dop - dout)))

    grid = (n_pad // tm,)

    # Advisory cost estimate for XLA scheduling around this mem-bound call.
    itemsize = jnp.dtype(dtype).itemsize
    flops = 2 * n_pad * (d1p + d2p) * dhp + 2 * n_pad * dhp * dop
    bytes_accessed = itemsize * (
        n_pad * (d1p + d2p) + n_pad * dop
        + (d1p + d2p) * dhp + dhp + dhp * dop + dop
    )

    # VMEM budget: double-buffered activation/output tiles + resident weights.
    vmem_bytes = itemsize * (
        2 * tm * (d1p + d2p) + 2 * tm * dop
        + (d1p + d2p) * dhp + dhp + dhp * dop + dop
    )
    compiler_kwargs = dict(dimension_semantics=("parallel",))
    if vmem_bytes > 16 * 1024 * 1024:
        # Leave headroom but stay compatible with v7x's smaller (64 MiB) VMEM.
        compiler_kwargs["vmem_limit_bytes"] = int(min(vmem_bytes * 3 // 2,
                                                      60 * 1024 * 1024))

    cost = pl.CostEstimate(flops=int(flops), transcendentals=0,
                           bytes_accessed=int(bytes_accessed))

    def _run(resident_spec):
        return pl.pallas_call(
            merge_layer_kernel,
            out_shape=jax.ShapeDtypeStruct((n_pad, dop), dtype),
            grid=grid,
            in_specs=[
                pl.BlockSpec((tm, d1p), lambda i: (i, 0)),   # x1 row tile
                pl.BlockSpec((tm, d2p), lambda i: (i, 0)),   # x2 row tile
                resident_spec((d1p, dhp)),                   # fc1 weight (x1 part)
                resident_spec((d2p, dhp)),                   # fc1 weight (x2 part)
                resident_spec((1, dhp)),                     # fc1 bias
                resident_spec((dhp, dop)),                   # fc2 weight
                resident_spec((1, dop)),                     # fc2 bias
            ],
            out_specs=pl.BlockSpec((tm, dop), lambda i: (i, 0)),
            compiler_params=pltpu.CompilerParams(**compiler_kwargs),
            cost_estimate=cost,
        )(x1p, x2p, w1a, w1b, b1p, w2p, b2p)

    def _single_buffered(shape):
        # Grid-invariant operands: no need to double-buffer them.
        return pl.BlockSpec(shape, lambda i: (0,) * len(shape),
                            pipeline_mode=pl.Buffered(1))

    def _default_buffered(shape):
        return pl.BlockSpec(shape, lambda i: (0,) * len(shape))

    try:
        out = _run(_single_buffered)
    except Exception:
        # Fallback if pipeline_mode=pl.Buffered(1) is unsupported on this JAX/Mosaic.
        out = _run(_default_buffered)

    return out[:N, :dout]


def init_params(key, dim1, dim2, dim3, dim4, dtype=jnp.float32):
    """Mimics MergeLayer init: xavier_normal_ weights, PyTorch-default biases.
    Weights returned pre-transposed ([in, out]) relative to torch's [out, in]."""
    din = dim1 + dim2
    k1, k2, k3, k4 = jax.random.split(key, 4)
    std1 = (2.0 / (din + dim3)) ** 0.5
    std2 = (2.0 / (dim3 + dim4)) ** 0.5
    w1 = std1 * jax.random.normal(k1, (din, dim3), dtype)    # fc1.weight.T
    w2 = std2 * jax.random.normal(k3, (dim3, dim4), dtype)   # fc2.weight.T
    b1 = jax.random.uniform(k2, (dim3,), dtype, -1.0 / din ** 0.5, 1.0 / din ** 0.5)
    b2 = jax.random.uniform(k4, (dim4,), dtype, -1.0 / dim3 ** 0.5, 1.0 / dim3 ** 0.5)
    return w1, b1, w2, b2


def reference(x1, x2, w1, b1, w2, b2):
    x = jnp.concatenate([x1, x2], axis=1)
    h = jnp.maximum(x @ w1 + b1, 0.0)
    return h @ w2 + b2


if __name__ == "__main__":
    key = jax.random.PRNGKey(0)
    k1, k2, kp = jax.random.split(key, 3)

    # Small MergeLayer shapes: batch=13 (intentionally ragged), dim1=24, dim2=40,
    # hidden dim3=32, output dim4=8. The wrapper pads rows/features internally.
    N, dim1, dim2, dim3, dim4 = 13, 24, 40, 32, 8
    x1 = jax.random.normal(k1, (N, dim1), jnp.float32)
    x2 = jax.random.normal(k2, (N, dim2), jnp.float32)
    w1, b1, w2, b2 = init_params(kp, dim1, dim2, dim3, dim4)

    out = merge_layer(x1, x2, w1, b1, w2, b2)
    out = jax.block_until_ready(out)

    ref = reference(x1, x2, w1, b1, w2, b2)
    assert out.shape == (N, dim4), out.shape
    assert jnp.allclose(out, ref, atol=1e-5, rtol=1e-5), "mismatch vs reference"

    print("KERNEL_OK")
</pallas_src>

<mosaic_0001>
module attributes {stable_mosaic.version = 11 : i64} {
  func.func @merge_layer_kernel(%arg0: i32, %arg1: memref<16x128xf32, #tpu.memory_space<vmem>>, %arg2: memref<16x128xf32, #tpu.memory_space<vmem>>, %arg3: memref<128x128xf32, #tpu.memory_space<vmem>>, %arg4: memref<128x128xf32, #tpu.memory_space<vmem>>, %arg5: memref<1x128xf32, #tpu.memory_space<vmem>>, %arg6: memref<128x128xf32, #tpu.memory_space<vmem>>, %arg7: memref<1x128xf32, #tpu.memory_space<vmem>>, %arg8: memref<16x128xf32, #tpu.memory_space<vmem>>) attributes {dimension_semantics = [#tpu.dimension_semantics<parallel>], iteration_bounds = array<i64: 1>, scalar_prefetch = 0 : i64, scratch_operands = 0 : i64, tpu.core_type = #tpu.core_type<tc>, window_params = [{transform_indices = @transform_0, window_bounds = array<i64: 16, 128>}, {transform_indices = @transform_1, window_bounds = array<i64: 16, 128>}, {pipeline_mode = #tpu.pipeline_mode<synchronous>, transform_indices = @transform_2, window_bounds = array<i64: 128, 128>}, {pipeline_mode = #tpu.pipeline_mode<synchronous>, transform_indices = @transform_3, window_bounds = array<i64: 128, 128>}, {pipeline_mode = #tpu.pipeline_mode<synchronous>, transform_indices = @transform_4, window_bounds = array<i64: 1, 128>}, {pipeline_mode = #tpu.pipeline_mode<synchronous>, transform_indices = @transform_5, window_bounds = array<i64: 128, 128>}, {pipeline_mode = #tpu.pipeline_mode<synchronous>, transform_indices = @transform_6, window_bounds = array<i64: 1, 128>}, {transform_indices = @transform_7, window_bounds = array<i64: 16, 128>}]} {
    %c0 = arith.constant 0 : index
    %c0_0 = arith.constant 0 : index
    %0 = vector.load %arg1[%c0, %c0_0] : memref<16x128xf32, #tpu.memory_space<vmem>>, vector<16x128xf32>
    %c0_1 = arith.constant 0 : index
    %c0_2 = arith.constant 0 : index
    %1 = vector.load %arg3[%c0_1, %c0_2] : memref<128x128xf32, #tpu.memory_space<vmem>>, vector<128x128xf32>
    %cst = arith.constant dense<0.000000e+00> : vector<16x128xf32>
    %2 = tpu.matmul %0, %1, %cst {dimension_numbers = #tpu.dot_dimension_numbers<[1], [0], [0], [1], [0, 0, 1, 1], [], []>} : vector<16x128xf32>, vector<128x128xf32>, vector<16x128xf32> -> vector<16x128xf32>
    %c0_3 = arith.constant 0 : index
    %c0_4 = arith.constant 0 : index
    %3 = vector.load %arg2[%c0_3, %c0_4] : memref<16x128xf32, #tpu.memory_space<vmem>>, vector<16x128xf32>
    %c0_5 = arith.constant 0 : index
    %c0_6 = arith.constant 0 : index
    %4 = vector.load %arg4[%c0_5, %c0_6] : memref<128x128xf32, #tpu.memory_space<vmem>>, vector<128x128xf32>
    %cst_7 = arith.constant dense<0.000000e+00> : vector<16x128xf32>
    %5 = tpu.matmul %3, %4, %cst_7 {dimension_numbers = #tpu.dot_dimension_numbers<[1], [0], [0], [1], [0, 0, 1, 1], [], []>} : vector<16x128xf32>, vector<128x128xf32>, vector<16x128xf32> -> vector<16x128xf32>
    %6 = arith.addf %2, %5 : vector<16x128xf32>
    %c0_8 = arith.constant 0 : index
    %c0_9 = arith.constant 0 : index
    %7 = vector.load %arg5[%c0_8, %c0_9] : memref<1x128xf32, #tpu.memory_space<vmem>>, vector<1x128xf32>
    %8 = vector.broadcast %7 : vector<1x128xf32> to vector<16x128xf32>
    %9 = arith.addf %6, %8 : vector<16x128xf32>
    %cst_10 = arith.constant 0.000000e+00 : f32
    %10 = vector.broadcast %cst_10 : f32 to vector<16x128xf32>
    %11 = arith.maximumf %9, %10 : vector<16x128xf32>
    %c0_11 = arith.constant 0 : index
    %c0_12 = arith.constant 0 : index
    %12 = vector.load %arg6[%c0_11, %c0_12] : memref<128x128xf32, #tpu.memory_space<vmem>>, vector<128x128xf32>
    %cst_13 = arith.constant dense<0.000000e+00> : vector<16x128xf32>
    %13 = tpu.matmul %11, %12, %cst_13 {dimension_numbers = #tpu.dot_dimension_numbers<[1], [0], [0], [1], [0, 0, 1, 1], [], []>} : vector<16x128xf32>, vector<128x128xf32>, vector<16x128xf32> -> vector<16x128xf32>
    %c0_14 = arith.constant 0 : index
    %c0_15 = arith.constant 0 : index
    %14 = vector.load %arg7[%c0_14, %c0_15] : memref<1x128xf32, #tpu.memory_space<vmem>>, vector<1x128xf32>
    %15 = vector.broadcast %14 : vector<1x128xf32> to vector<16x128xf32>
    %16 = arith.addf %13, %15 : vector<16x128xf32>
    %c0_16 = arith.constant 0 : index
    %c0_17 = arith.constant 0 : index
    %17 = vector.load %arg8[%c0_16, %c0_17] : memref<16x128xf32, #tpu.memory_space<vmem>>, vector<16x128xf32>
    tpu.vector_store %arg8[%c0_16, %c0_17], %16 {strides = array<i32>} : memref<16x128xf32, #tpu.memory_space<vmem>>, vector<16x128xf32>,
    return
  }
  func.func @transform_0(%arg0: i32) -> (i32, i32) {
    %c0_i32 = arith.constant 0 : i32
    %c0_i32_0 = arith.constant 0 : i32
    return %arg0, %c0_i32 : i32, i32
  }
  func.func @transform_1(%arg0: i32) -> (i32, i32) {
    %c0_i32 = arith.constant 0 : i32
    %c0_i32_0 = arith.constant 0 : i32
    return %arg0, %c0_i32 : i32, i32
  }
  func.func @transform_2(%arg0: i32) -> (i32, i32) {
    %c0_i32 = arith.constant 0 : i32
    %c0_i32_0 = arith.constant 0 : i32
    %c0_i32_1 = arith.constant 0 : i32
    return %c0_i32, %c0_i32_0 : i32, i32
  }
  func.func @transform_3(%arg0: i32) -> (i32, i32) {
    %c0_i32 = arith.constant 0 : i32
    %c0_i32_0 = arith.constant 0 : i32
    %c0_i32_1 = arith.constant 0 : i32
    return %c0_i32, %c0_i32_0 : i32, i32
  }
  func.func @transform_4(%arg0: i32) -> (i32, i32) {
    %c0_i32 = arith.constant 0 : i32
    %c0_i32_0 = arith.constant 0 : i32
    %c0_i32_1 = arith.constant 0 : i32
    return %c0_i32, %c0_i32_0 : i32, i32
  }
  func.func @transform_5(%arg0: i32) -> (i32, i32) {
    %c0_i32 = arith.constant 0 : i32
    %c0_i32_0 = arith.constant 0 : i32
    %c0_i32_1 = arith.constant 0 : i32
    return %c0_i32, %c0_i32_0 : i32, i32
  }
  func.func @transform_6(%arg0: i32) -> (i32, i32) {
    %c0_i32 = arith.constant 0 : i32
    %c0_i32_0 = arith.constant 0 : i32
    %c0_i32_1 = arith.constant 0 : i32
    return %c0_i32, %c0_i32_0 : i32, i32
  }
  func.func @transform_7(%arg0: i32) -> (i32, i32) {
    %c0_i32 = arith.constant 0 : i32
    %c0_i32_0 = arith.constant 0 : i32
    return %arg0, %c0_i32 : i32, i32
  }
}

module attributes {stable_mosaic.version = 11 : i64} {
  func.func @merge_layer_kernel(%arg0: i32, %arg1: memref<16x128xf32, #tpu.memory_space<vmem>>, %arg2: memref<16x128xf32, #tpu.memory_space<vmem>>, %arg3: memref<128x128xf32, #tpu.memory_space<vmem>>, %arg4: memref<128x128xf32, #tpu.memory_space<vmem>>, %arg5: memref<1x128xf32, #tpu.memory_space<vmem>>, %arg6: memref<128x128xf32, #tpu.memory_space<vmem>>, %arg7: memref<1x128xf32, #tpu.memory_space<vmem>>, %arg8: memref<16x128xf32, #tpu.memory_space<vmem>>) attributes {dimension_semantics = [#tpu.dimension_semantics<parallel>], iteration_bounds = array<i64: 1>, scalar_prefetch = 0 : i64, scratch_operands = 0 : i64, tpu.core_type = #tpu.core_type<tc>, window_params = [{transform_indices = @transform_0, window_bounds = array<i64: 16, 128>}, {transform_indices = @transform_1, window_bounds = array<i64: 16, 128>}, {pipeline_mode = #tpu.pipeline_mode<synchronous>, transform_indices = @transform_2, window_bounds = array<i64: 128, 128>}, {pipeline_mode = #tpu.pipeline_mode<synchronous>, transform_indices = @transform_3, window_bounds = array<i64: 128, 128>}, {pipeline_mode = #tpu.pipeline_mode<synchronous>, transform_indices = @transform_4, window_bounds = array<i64: 1, 128>}, {pipeline_mode = #tpu.pipeline_mode<synchronous>, transform_indices = @transform_5, window_bounds = array<i64: 128, 128>}, {pipeline_mode = #tpu.pipeline_mode<synchronous>, transform_indices = @transform_6, window_bounds = array<i64: 1, 128>}, {transform_indices = @transform_7, window_bounds = array<i64: 16, 128>}]} {
    %c0 = arith.constant 0 : index
    %c0_0 = arith.constant 0 : index
    %0 = vector.load %arg1[%c0, %c0_0] : memref<16x128xf32, #tpu.memory_space<vmem>>, vector<16x128xf32>
    %c0_1 = arith.constant 0 : index
    %c0_2 = arith.constant 0 : index
    %1 = vector.load %arg3[%c0_1, %c0_2] : memref<128x128xf32, #tpu.memory_space<vmem>>, vector<128x128xf32>
    %cst = arith.constant dense<0.000000e+00> : vector<16x128xf32>
    %2 = tpu.matmul %0, %1, %cst {dimension_numbers = #tpu.dot_dimension_numbers<[1], [0], [0], [1], [0, 0, 1, 1], [], []>} : vector<16x128xf32>, vector<128x128xf32>, vector<16x128xf32> -> vector<16x128xf32>
    %c0_3 = arith.constant 0 : index
    %c0_4 = arith.constant 0 : index
    %3 = vector.load %arg2[%c0_3, %c0_4] : memref<16x128xf32, #tpu.memory_space<vmem>>, vector<16x128xf32>
    %c0_5 = arith.constant 0 : index
    %c0_6 = arith.constant 0 : index
    %4 = vector.load %arg4[%c0_5, %c0_6] : memref<128x128xf32, #tpu.memory_space<vmem>>, vector<128x128xf32>
    %cst_7 = arith.constant dense<0.000000e+00> : vector<16x128xf32>
    %5 = tpu.matmul %3, %4, %cst_7 {dimension_numbers = #tpu.dot_dimension_numbers<[1], [0], [0], [1], [0, 0, 1, 1], [], []>} : vector<16x128xf32>, vector<128x128xf32>, vector<16x128xf32> -> vector<16x128xf32>
    %6 = arith.addf %2, %5 : vector<16x128xf32>
    %c0_8 = arith.constant 0 : index
    %c0_9 = arith.constant 0 : index
    %7 = vector.load %arg5[%c0_8, %c0_9] : memref<1x128xf32, #tpu.memory_space<vmem>>, vector<1x128xf32>
    %8 = vector.broadcast %7 : vector<1x128xf32> to vector<16x128xf32>
    %9 = arith.addf %6, %8 : vector<16x128xf32>
    %cst_10 = arith.constant 0.000000e+00 : f32
    %10 = vector.broadcast %cst_10 : f32 to vector<16x128xf32>
    %11 = arith.maximumf %9, %10 : vector<16x128xf32>
    %c0_11 = arith.constant 0 : index
    %c0_12 = arith.constant 0 : index
    %12 = vector.load %arg6[%c0_11, %c0_12] : memref<128x128xf32, #tpu.memory_space<vmem>>, vector<128x128xf32>
    %cst_13 = arith.constant dense<0.000000e+00> : vector<16x128xf32>
    %13 = tpu.matmul %11, %12, %cst_13 {dimension_numbers = #tpu.dot_dimension_numbers<[1], [0], [0], [1], [0, 0, 1, 1], [], []>} : vector<16x128xf32>, vector<128x128xf32>, vector<16x128xf32> -> vector<16x128xf32>
    %c0_14 = arith.constant 0 : index
    %c0_15 = arith.constant 0 : index
    %14 = vector.load %arg7[%c0_14, %c0_15] : memref<1x128xf32, #tpu.memory_space<vmem>>, vector<1x128xf32>
    %15 = vector.broadcast %14 : vector<1x128xf32> to vector<16x128xf32>
    %16 = arith.addf %13, %15 : vector<16x128xf32>
    %c0_16 = arith.constant 0 : index
    %c0_17 = arith.constant 0 : index
    %17 = vector.load %arg8[%c0_16, %c0_17] : memref<16x128xf32, #tpu.memory_space<vmem>>, vector<16x128xf32>
    tpu.vector_store %arg8[%c0_16, %c0_17], %16 {strides = array<i32>} : memref<16x128xf32, #tpu.memory_space<vmem>>, vector<16x128xf32>,
    return
  }
  func.func @transform_0(%arg0: i32) -> (i32, i32) {
    %c0_i32 = arith.constant 0 : i32
    %c0_i32_0 = arith.constant 0 : i32
    return %arg0, %c0_i32 : i32, i32
  }
  func.func @transform_1(%arg0: i32) -> (i32, i32) {
    %c0_i32 = arith.constant 0 : i32
    %c0_i32_0 = arith.constant 0 : i32
    return %arg0, %c0_i32 : i32, i32
  }
  func.func @transform_2(%arg0: i32) -> (i32, i32) {
    %c0_i32 = arith.constant 0 : i32
    %c0_i32_0 = arith.constant 0 : i32
    %c0_i32_1 = arith.constant 0 : i32
    return %c0_i32, %c0_i32_0 : i32, i32
  }
  func.func @transform_3(%arg0: i32) -> (i32, i32) {
    %c0_i32 = arith.constant 0 : i32
    %c0_i32_0 = arith.constant 0 : i32
    %c0_i32_1 = arith.constant 0 : i32
    return %c0_i32, %c0_i32_0 : i32, i32
  }
  func.func @transform_4(%arg0: i32) -> (i32, i32) {
    %c0_i32 = arith.constant 0 : i32
    %c0_i32_0 = arith.constant 0 : i32
    %c0_i32_1 = arith.constant 0 : i32
    return %c0_i32, %c0_i32_0 : i32, i32
  }
  func.func @transform_5(%arg0: i32) -> (i32, i32) {
    %c0_i32 = arith.constant 0 : i32
    %c0_i32_0 = arith.constant 0 : i32
    %c0_i32_1 = arith.constant 0 : i32
    return %c0_i32, %c0_i32_0 : i32, i32
  }
  func.func @transform_6(%arg0: i32) -> (i32, i32) {
    %c0_i32 = arith.constant 0 : i32
    %c0_i32_0 = arith.constant 0 : i32
    %c0_i32_1 = arith.constant 0 : i32
    return %c0_i32, %c0_i32_0 : i32, i32
  }
  func.func @transform_7(%arg0: i32) -> (i32, i32) {
    %c0_i32 = arith.constant 0 : i32
    %c0_i32_0 = arith.constant 0 : i32
    return %arg0, %c0_i32 : i32, i32
  }
}

</mosaic_0001>

<bundles_post_ra>
// kernel: tpu_custom_call.1
= control target key start
LH: loop header
LB: loop body
LE: loop exit
PB: predicated region body
PF: predicated region fallthrough
CT: control target
= control target key end

     0   :  { %12 = vsyncpa [#allocation3], 0  ;;  %s976_s0 = inlined_call_operand.hbm [shape: f32[16,128], index: 0, kind: input, shape index: {}]   ;;  %s977_s1 = inlined_call_operand.hbm [shape: f32[16,128], index: 1, kind: input, shape index: {}]   ;;  %s978_s2 = inlined_call_operand.hbm [shape: f32[128,128], index: 2, kind: input, shape index: {}]   ;;  %s979_s3 = inlined_call_operand.hbm [shape: f32[128,128], index: 3, kind: input, shape index: {}]   ;;  %s980_s4 = inlined_call_operand.vmem [shape: f32[1,128], index: 4, kind: input, shape index: {}]   ;;  %s981_s5 = inlined_call_operand.hbm [shape: f32[128,128], index: 5, kind: input, shape index: {}]   ;;  %s982_s6 = inlined_call_operand.vmem [shape: f32[1,128], index: 6, kind: input, shape index: {}]   ;;  %s983_s7 = inlined_call_operand.hbm [shape: f32[16,128], index: 7, kind: output, shape index: {}]  }
   0x1   :  { %13 = vsyncpa [#allocation6], 0 }
   0x2   :  { %14 = vsyncpa [#allocation9], 0 }
   0x3   :  { %15 = vsyncpa [#allocation4], 0  ;;  %s818_s24 = smov [#allocation5]   ;;  %s819_s26 = smov [#allocation8]  }
   0x4   :  { %s33_s25 = sshll.u32 %s818_s24, 4  ;;  %s57_s27 = sshll.u32 %s819_s26, 4  ;;  %s34_s25 = int_to_ptr.vmem [resolvable:$true] %s33_s25  ;;  %s866_s27 = int_to_ptr.vmem [resolvable:$true] %s57_s27 }
   0x5   :  { %s678_s30 = scalar_lea.hbm %s977_s1, 256 }
   0x6   :  { %p679_p0 = scmp.ne.s32.totalorder %s977_s1, %s678_s30  ;;  %p682_p1 = scmp.lt.u32.totalorder %s678_s30, %s977_s1 }
   0x8   :  { %p684_p2 = pnand %p682_p1, %p679_p0 }
   0xa   :  { %687 = shalt.err (!%p684_p2)
}
   0xb   :  { %s688_s12 = scalar_lea.vmem %s34_s25, 256  ;;  %p693_p4 = scmp.lt.s32.totalorder %s34_s25, %s34_s25 }
   0xc   :  { %p689_p3 = scmp.ne.s32.totalorder %s34_s25, %s688_s12  ;;  %p694_p5 = scmp.lt.s32.totalorder %s688_s12, %s688_s12 }
   0xe   :  { %p695_p6 = por %p694_p5, %p693_p4 }
  0x10   :  { %p696_p7 = pnand %p695_p6, %p689_p3 }
  0x12   :  { %699 = shalt.err (!%p696_p7)
}
  0x13   :  { %s820_s13 = smov 128   ;;  %s821_s14 = smov 8  }
  0x14   :  { %39 = dma.hbm_to_vmem [thread:$0]  %s977_s1, 256, %s34_s25, [#allocation6], %s820_s13, %s820_s13, %s821_s14  }
  0x15   :  { %s700_s19 = scalar_lea.hbm %s979_s3, 2048 }
  0x16   :  { %p701_p8 = scmp.ne.s32.totalorder %s979_s3, %s700_s19  ;;  %p704_p9 = scmp.lt.u32.totalorder %s700_s19, %s979_s3 }
  0x18   :  { %p706_p10 = pnand %p704_p9, %p701_p8 }
  0x1a   :  { %709 = shalt.err (!%p706_p10)
}
  0x1b   :  { %s710_s24 = scalar_lea.vmem %s866_s27, 2048  ;;  %p715_p12 = scmp.lt.s32.totalorder %s866_s27, %s866_s27 }
  0x1c   :  { %p711_p11 = scmp.ne.s32.totalorder %s866_s27, %s710_s24  ;;  %p716_p13 = scmp.lt.s32.totalorder %s710_s24, %s710_s24 }
  0x1e   :  { %p717_p0 = por %p716_p13, %p715_p12 }
  0x20   :  { %p718_p1 = pnand %p717_p0, %p711_p11 }
  0x22   :  { %721 = shalt.err (!%p718_p1)
}
  0x23   :  { %63 = dma.hbm_to_vmem [thread:$0]  %s979_s3, 2048, %s866_s27, [#allocation9], %s820_s13, %s820_s13, %s821_s14  }
  0x24   :  { %s822_s26 = smov [#allocation2]   ;;  %s823_s29 = smov [#allocation7]  }
  0x25   :  { %s21_s28 = sshll.u32 %s822_s26, 4  ;;  %s45_s30 = sshll.u32 %s823_s29, 4  ;;  %s22_s28 = int_to_ptr.vmem [resolvable:$true] %s21_s28  ;;  %s903_s30 = int_to_ptr.vmem [resolvable:$true] %s45_s30 }
  0x26   :  { %s722_s10 = scalar_lea.hbm %s976_s0, 256 }
  0x27   :  { %p723_p2 = scmp.ne.s32.totalorder %s976_s0, %s722_s10  ;;  %p726_p3 = scmp.lt.u32.totalorder %s722_s10, %s976_s0 }
  0x29   :  { %p728_p4 = pnand %p726_p3, %p723_p2 }
  0x2b   :  { %731 = shalt.err (!%p728_p4)
}
  0x2c   :  { %s732_s3 = scalar_lea.vmem %s22_s28, 256  ;;  %p737_p6 = scmp.lt.s32.totalorder %s22_s28, %s22_s28 }
  0x2d   :  { %p733_p5 = scmp.ne.s32.totalorder %s22_s28, %s732_s3  ;;  %p738_p7 = scmp.lt.s32.totalorder %s732_s3, %s732_s3 }
  0x2f   :  { %p739_p8 = por %p738_p7, %p737_p6 }
  0x31   :  { %p740_p9 = pnand %p739_p8, %p733_p5 }
  0x33   :  { %743 = shalt.err (!%p740_p9)
}
  0x34   :  { %27 = dma.hbm_to_vmem [thread:$0]  %s976_s0, 256, %s22_s28, [#allocation3], %s820_s13, %s820_s13, %s821_s14  }
  0x35   :  { %s744_s20 = scalar_lea.hbm %s978_s2, 2048 }
  0x36   :  { %p745_p10 = scmp.ne.s32.totalorder %s978_s2, %s744_s20  ;;  %p748_p11 = scmp.lt.u32.totalorder %s744_s20, %s978_s2 }
  0x38   :  { %p750_p12 = pnand %p748_p11, %p745_p10 }
  0x3a   :  { %753 = shalt.err (!%p750_p12)
}
  0x3b   :  { %s754_s1 = scalar_lea.vmem %s903_s30, 2048  ;;  %p759_p0 = scmp.lt.s32.totalorder %s903_s30, %s903_s30 }
  0x3c   :  { %p755_p13 = scmp.ne.s32.totalorder %s903_s30, %s754_s1  ;;  %p760_p1 = scmp.lt.s32.totalorder %s754_s1, %s754_s1 }
  0x3e   :  { %p761_p2 = por %p760_p1, %p759_p0 }
  0x40   :  { %p762_p3 = pnand %p761_p2, %p755_p13 }
  0x42   :  { %765 = shalt.err (!%p762_p3)
}
  0x43   :  { %51 = dma.hbm_to_vmem [thread:$0]  %s978_s2, 2048, %s903_s30, [#allocation6], %s820_s13, %s820_s13, %s821_s14  }
  0x44   :  { %s824_s26 = smov [#allocation10]   ;;  %s766_s9 = scalar_lea.hbm %s981_s5, 2048 }
  0x45   :  { %s71_s28 = sshll.u32 %s824_s26, 4  ;;  %p767_p4 = scmp.ne.s32.totalorder %s981_s5, %s766_s9  ;;  %s72_s28 = int_to_ptr.vmem [resolvable:$true] %s71_s28 }
  0x46   :  { %p770_p5 = scmp.lt.u32.totalorder %s766_s9, %s981_s5 }
  0x48   :  { %p772_p6 = pnand %p770_p5, %p767_p4 }
  0x4a   :  { %775 = shalt.err (!%p772_p6)
}
  0x4b   :  { %s776_s16 = scalar_lea.vmem %s72_s28, 2048  ;;  %p781_p8 = scmp.lt.s32.totalorder %s72_s28, %s72_s28 }
  0x4c   :  { %p777_p7 = scmp.ne.s32.totalorder %s72_s28, %s776_s16  ;;  %p782_p9 = scmp.lt.s32.totalorder %s776_s16, %s776_s16 }
  0x4e   :  { %p783_p10 = por %p782_p9, %p781_p8 }
  0x50   :  { %p784_p11 = pnand %p783_p10, %p777_p7 }
  0x52   :  { %787 = shalt.err (!%p784_p11)
}
  0x53   :  { %77 = dma.hbm_to_vmem [thread:$0]  %s981_s5, 2048, %s72_s28, [#allocation9], %s820_s13, %s820_s13, %s821_s14  }
  0x54   :  { %810 = dma.done.wait [#allocation3], 256  }
  0x55   :  { %811 = vsyncadd [#allocation3], 4294967040 }
  0x56   :  { %812 = dma.done.wait [#allocation6], 2304  }
  0x57   :  { %813 = vsyncadd [#allocation6], 4294964992 }
  0x58   :  { %814 = dma.done.wait [#allocation9], 4096  }
  0x59   :  { %815 = vsyncadd [#allocation9], 4294963200  ;;  %v115_v0 = vld [vmem:[#allocation8] sm:$0xff]  ;;  %v116_v1 = vld [vmem:[#allocation8 + $0x8] sm:$0xff]  ;;  %s825_s18 = smov [#allocation11]  }
  0x5a   :  { %v117_v2 = vld [vmem:[#allocation8 + $0x10] sm:$0xff]  ;;  %v572_v3 = vpack.c.bf16 %v116_v1, %v115_v0  ;;  %v118_v4 = vld [vmem:[#allocation8 + $0x18] sm:$0xff]  ;;  %v119_v6 = vld [vmem:[#allocation8 + $0x20] sm:$0xff]  ;;  %s397_s19 = sshll.u32 %s825_s18, 4  ;;  %s398_s19 = int_to_ptr.vmem [resolvable:$true] %s397_s19 }
  0x5b   :  { %v576_v5 = vpack.c.bf16 %v118_v4, %v117_v2  ;;  %v120_v7 = vld [vmem:[#allocation8 + $0x28] sm:$0xff]  ;;  %v113_v9 = vld [vmem:[#allocation5] sm:$0xff]  ;;  %v122_v11 = vld [vmem:[#allocation8 + $0x38] sm:$0xff]  ;;  %p793_p13 = scmp.lt.s32.totalorder %s398_s19, %s398_s19 }
  0x5c   :  { %573 = vmatprep.subr.bf16.mxu0 %v572_v3  ;;  %v580_v8 = vpack.c.bf16 %v120_v7, %v119_v6  ;;  %v121_v10 = vld [vmem:[#allocation8 + $0x30] sm:$0xff]  ;;  %499 = vmatprep.mubr.f32.mxu0 %v113_v9  ;;  %v123_v13 = vld [vmem:[#allocation8 + $0x40] sm:$0xff]  ;;  %v124_v14 = vld [vmem:[#allocation8 + $0x48] sm:$0xff] }
  0x5d   :  { %575 = vmatpush3.bf16.msra.mxu0 %v572_v3  ;;  %v584_v12 = vpack.c.bf16 %v122_v11, %v121_v10  ;;  %v292_v15 = vld [vmem:[#allocation10] sm:$0xff]  ;;  %v293_v16 = vld [vmem:[#allocation10 + $0x8] sm:$0xff]  ;;  %v294_v17 = vld [vmem:[#allocation10 + $0x10] sm:$0xff]  ;;  %v588_v18 = vpack.c.bf16 %v124_v14, %v123_v13 }
  0x5e   :  { %577 = vmatprep.subr.bf16.mxu0 %v576_v5  ;;  %v125_v19 = vld [vmem:[#allocation8 + $0x50] sm:$0xff]  ;;  %v636_v20 = vpack.c.bf16 %v293_v16, %v292_v15  ;;  %v295_v21 = vld [vmem:[#allocation10 + $0x18] sm:$0xff]  ;;  %v296_v24 = vld [vmem:[#allocation10 + $0x20] sm:$0xff] }
  0x5f   :  { %v126_v22 = vld [vmem:[#allocation8 + $0x58] sm:$0xff]  ;;  %v640_v23 = vpack.c.bf16 %v295_v21, %v294_v17  ;;  %v297_v25 = vld [vmem:[#allocation10 + $0x28] sm:$0xff]  ;;  %v127_v27 = vld [vmem:[#allocation8 + $0x60] sm:$0xff] }
  0x60   :  { %637 = vmatprep.subr.bf16.mxu1 %v636_v20  ;;  %v592_v26 = vpack.c.bf16 %v126_v22, %v125_v19  ;;  %v644_v28 = vpack.c.bf16 %v297_v25, %v296_v24  ;;  %v128_v29 = vld [vmem:[#allocation8 + $0x68] sm:$0xff]  ;;  %v298_v30 = vld [vmem:[#allocation10 + $0x30] sm:$0xff]  ;;  %v299_v31 = vld [vmem:[#allocation10 + $0x38] sm:$0xff] }
  0x61   :  { %579 = vmatpush3.bf16.msra.mxu0 %v576_v5  ;;  %639 = vmatpush3.bf16.msra.mxu1 %v636_v20  ;;  %v596_v32 = vpack.c.bf16 %v128_v29, %v127_v27  ;;  %v129_v33 = vld [vmem:[#allocation8 + $0x70] sm:$0xff]  ;;  %v648_v34 = vpack.c.bf16 %v299_v31, %v298_v30  ;;  %v130_v35 = vld [vmem:[#allocation8 + $0x78] sm:$0xff]  ;;  %v300_v36 = vld [vmem:[#allocation10 + $0x40] sm:$0xff] }
  0x62   :  { %581 = vmatprep.subr.bf16.mxu0 %v580_v8  ;;  %641 = vmatprep.subr.bf16.mxu1 %v640_v23  ;;  %v301_v37 = vld [vmem:[#allocation10 + $0x48] sm:$0xff]  ;;  %v600_v38 = vpack.c.bf16 %v130_v35, %v129_v33  ;;  %v97_v39 = vld [vmem:[#allocation7] sm:$0xff]  ;;  %v302_v42 = vld [vmem:[#allocation10 + $0x50] sm:$0xff] }
  0x63   :  { %v652_v40 = vpack.c.bf16 %v301_v37, %v300_v36  ;;  %v98_v41 = vld [vmem:[#allocation7 + $0x8] sm:$0xff]  ;;  %v303_v43 = vld [vmem:[#allocation10 + $0x58] sm:$0xff]  ;;  %v99_v46 = vld [vmem:[#allocation7 + $0x10] sm:$0xff] }
  0x64   :  { %v604_v44 = vpack.c.bf16 %v98_v41, %v97_v39  ;;  %v656_v45 = vpack.c.bf16 %v303_v43, %v302_v42  ;;  %v100_v47 = vld [vmem:[#allocation7 + $0x18] sm:$0xff]  ;;  %v304_v48 = vld [vmem:[#allocation10 + $0x60] sm:$0xff]  ;;  %v305_v49 = vld [vmem:[#allocation10 + $0x68] sm:$0xff] }
  0x65   :  { %583 = vmatpush3.bf16.msra.mxu0 %v580_v8  ;;  %643 = vmatpush3.bf16.msra.mxu1 %v640_v23  ;;  %v114_v50 = vld [vmem:[#allocation5 + $0x8] sm:$0xff]  ;;  %v608_v51 = vpack.c.bf16 %v100_v47, %v99_v46  ;;  %v95_v52 = vld [vmem:[#allocation2] sm:$0xff]  ;;  %v102_v54 = vld [vmem:[#allocation7 + $0x28] sm:$0xff]  ;;  %v660_v55 = vpack.c.bf16 %v305_v49, %v304_v48 }
  0x66   :  { %585 = vmatprep.subr.bf16.mxu0 %v584_v12  ;;  %645 = vmatprep.subr.bf16.mxu1 %v644_v28  ;;  %v101_v53 = vld [vmem:[#allocation7 + $0x20] sm:$0xff]  ;;  %v103_v57 = vld [vmem:[#allocation7 + $0x30] sm:$0xff]  ;;  %v104_v58 = vld [vmem:[#allocation7 + $0x38] sm:$0xff] }
  0x67   :  { %v612_v56 = vpack.c.bf16 %v102_v54, %v101_v53  ;;  %v616_v59 = vpack.c.bf16 %v104_v58, %v103_v57  ;;  %v105_v60 = vld [vmem:[#allocation7 + $0x40] sm:$0xff]  ;;  %v106_v61 = vld [vmem:[#allocation7 + $0x48] sm:$0xff]  ;;  %v107_v63 = vld [vmem:[#allocation7 + $0x50] sm:$0xff] }
  0x68   :  { %v620_v62 = vpack.c.bf16 %v106_v61, %v105_v60  ;;  %v108_v0 = vld [vmem:[#allocation7 + $0x58] sm:$0xff]  ;;  %v109_v2 = vld [vmem:[#allocation7 + $0x60] sm:$0xff]  ;;  %v110_v3 = vld [vmem:[#allocation7 + $0x68] sm:$0xff] }
  0x69   :  { %587 = vmatpush3.bf16.msra.mxu0 %v584_v12  ;;  %647 = vmatpush3.bf16.msra.mxu1 %v644_v28  ;;  %v624_v1 = vpack.c.bf16 %v108_v0, %v107_v63  ;;  %v628_v4 = vpack.c.bf16 %v110_v3, %v109_v2  ;;  %v111_v5 = vld [vmem:[#allocation7 + $0x70] sm:$0xff]  ;;  %v112_v6 = vld [vmem:[#allocation7 + $0x78] sm:$0xff]  ;;  %v96_v8 = vld [vmem:[#allocation2 + $0x8] sm:$0xff] }
  0x6a   :  { %589 = vmatprep.subr.bf16.mxu0 %v588_v18  ;;  %649 = vmatprep.subr.bf16.mxu1 %v648_v34  ;;  %v632_v7 = vpack.c.bf16 %v112_v6, %v111_v5  ;;  %v306_v9 = vld [vmem:[#allocation10 + $0x70] sm:$0xff]  ;;  %v307_v10 = vld [vmem:[#allocation10 + $0x78] sm:$0xff]  ;;  %v411_v12 = vld [vmem:[%s980_s4] ss:$0 sm:$0xff]  ;;  %s788_s4 = scalar_lea.vmem %s398_s19, 256 }
  0x6b   :  { %v664_v11 = vpack.c.bf16 %v307_v10, %v306_v9  ;;  %v412_v19 = vld [vmem:[%s982_s6] ss:$0 sm:$0xff]  ;;  %p789_p12 = scmp.ne.s32.totalorder %s398_s19, %s788_s4  ;;  %p794_p0 = scmp.lt.s32.totalorder %s788_s4, %s788_s4 }
  0x6d   :  { %591 = vmatpush3.bf16.msra.mxu0 %v588_v18  ;;  %651 = vmatpush3.bf16.msra.mxu1 %v648_v34  ;;  %p795_p1 = por %p794_p0, %p793_p13 }
  0x6e   :  { %593 = vmatprep.subr.bf16.mxu0 %v592_v26  ;;  %653 = vmatprep.subr.bf16.mxu1 %v652_v40 }
  0x6f   :  { %p796_p2 = pnand %p795_p1, %p789_p12 }
  0x71   :  { %595 = vmatpush3.bf16.msra.mxu0 %v592_v26  ;;  %655 = vmatpush3.bf16.msra.mxu1 %v652_v40 }
  0x72   :  { %597 = vmatprep.subr.bf16.mxu0 %v596_v32  ;;  %657 = vmatprep.subr.bf16.mxu1 %v656_v45 }
  0x75   :  { %599 = vmatpush3.bf16.msra.mxu0 %v596_v32  ;;  %659 = vmatpush3.bf16.msra.mxu1 %v656_v45 }
  0x76   :  { %601 = vmatprep.subr.bf16.mxu0 %v600_v38  ;;  %661 = vmatprep.subr.bf16.mxu1 %v660_v55 }
  0x79   :  { %603 = vmatpush3.bf16.msra.mxu0 %v600_v38  ;;  %663 = vmatpush3.bf16.msra.mxu1 %v660_v55 }
  0x7a   :  { %605 = vmatprep.subr.bf16.mxu0 %v604_v44  ;;  %665 = vmatprep.subr.bf16.mxu1 %v664_v11 }
  0x7c   :  { %500 = vmatmul.mubr.f32.vlgmr.msra.gmra.mrb[0].mxu0 %v114_v50 }
  0x7d   :  { %607 = vmatpush3.bf16.msra.mxu0 %v604_v44  ;;  %534 = vmatprep.mubr.f32.mxu0 %v95_v52 }
  0x7e   :  { %609 = vmatprep.subr.bf16.mxu0 %v608_v51  ;;  %667 = vmatpush3.bf16.msra.mxu1 %v664_v11 }
  0x81   :  { %611 = vmatpush3.bf16.msra.mxu0 %v608_v51 }
  0x82   :  { %613 = vmatprep.subr.bf16.mxu0 %v612_v56 }
  0x85   :  { %615 = vmatpush3.bf16.msra.mxu0 %v612_v56 }
  0x86   :  { %617 = vmatprep.subr.bf16.mxu0 %v616_v59 }
  0x89   :  { %619 = vmatpush3.bf16.msra.mxu0 %v616_v59 }
  0x8a   :  { %621 = vmatprep.subr.bf16.mxu0 %v620_v62 }
  0x8d   :  { %623 = vmatpush3.bf16.msra.mxu0 %v620_v62 }
  0x8e   :  { %625 = vmatprep.subr.bf16.mxu0 %v624_v1 }
  0x91   :  { %627 = vmatpush3.bf16.msra.mxu0 %v624_v1 }
  0x92   :  { %629 = vmatprep.subr.bf16.mxu0 %v628_v4 }
  0x95   :  { %631 = vmatpush3.bf16.msra.mxu0 %v628_v4 }
  0x96   :  { %633 = vmatprep.subr.bf16.mxu0 %v632_v7 }
  0x99   :  { %635 = vmatpush3.bf16.msra.mxu0 %v632_v7 }
  0x9c   :  { %535 = vmatmul.mubr.f32.vlgmr.msra.gmra.mrb[0].mxu0 %v96_v8 }
 0x16f   :  { %v536_v13 = vpop.f32.mrb[0].mxu0 }
 0x170   :  { %v289_v14 = vadd.f32 %v536_v13, %v411_v12  ;;  %v272_v15 = vpop.f32.mrb[1].mxu0 }
 0x171   :  { %v288_v16 = vadd.f32 %v411_v12, %v272_v15 }
 0x172   :  { %v291_v18 = vmax.f32 %v289_v14, 0.0 }
 0x173   :  { %v290_v17 = vmax.f32 %v288_v16, 0.0 }
 0x175   :  { %569 = vmatprep.mubr.f32.mxu1 %v290_v17 }
 0x176   :  { %570 = vmatmul.mubr.f32.vlgmr.msra.gmra.mrb[0].mxu1 %v291_v18 }
 0x249   :  { %v571_v20 = vpop.f32.mrb[0].mxu1 }
 0x24a   :  { %v387_v21 = vadd.f32 %v571_v20, %v412_v19  ;;  %v381_v22 = vpop.f32.mrb[1].mxu1 }
 0x24b   :  { %v382_v23 = vadd.f32 %v412_v19, %v381_v22 }
 0x24c   :  { %391 = vst [vmem:[#allocation11 + $0x8] sm:$0xff] %v387_v21 }
 0x24d   :  { %390 = vst [vmem:[#allocation11] sm:$0xff] %v382_v23 }
 0x24e   :  { %799 = shalt.err (!%p796_p2)
}
 0x24f   :  { %s800_s6 = scalar_lea.hbm %s983_s7, 256 }
 0x250   :  { %p801_p3 = scmp.ne.s32.totalorder %s983_s7, %s800_s6  ;;  %p804_p4 = scmp.lt.u32.totalorder %s800_s6, %s983_s7 }
 0x252   :  { %p806_p5 = pnand %p804_p4, %p801_p3 }
 0x254   :  { %809 = shalt.err (!%p806_p5)
}
 0x255   :  { %403 = dma.vmem_to_hbm [thread:$0]  %s398_s19, 256, %s983_s7, [#allocation4], %s820_s13, %s820_s13, %s821_s14  }
 0x256   :  { %816 = dma.done.wait [#allocation4], 256  }
 0x257   :  { %817 = vsyncadd [#allocation4], 4294967040 }
 0x258   :  { %407 = vsyncpa [#allocation3], 1 }
 0x259   :  { %408 = vsyncpa [#allocation6], 1 }
 0x25a   :  { %409 = vsyncpa [#allocation9], 1 }
 0x25b   :  { %410 = vsyncpa [#allocation4], 1 }

// kernel: tpu_custom_call.1
= control target key start
LH: loop header
LB: loop body
LE: loop exit
PB: predicated region body
PF: predicated region fallthrough
CT: control target
= control target key end

     0   :  { %12 = vsyncpa [#allocation3], 0  ;;  %s976_s0 = inlined_call_operand.hbm [shape: f32[16,128], index: 0, kind: input, shape index: {}]   ;;  %s977_s1 = inlined_call_operand.hbm [shape: f32[16,128], index: 1, kind: input, shape index: {}]   ;;  %s978_s2 = inlined_call_operand.hbm [shape: f32[128,128], index: 2, kind: input, shape index: {}]   ;;  %s979_s3 = inlined_call_operand.hbm [shape: f32[128,128], index: 3, kind: input, shape index: {}]   ;;  %s980_s4 = inlined_call_operand.vmem [shape: f32[1,128], index: 4, kind: input, shape index: {}]   ;;  %s981_s5 = inlined_call_operand.hbm [shape: f32[128,128], index: 5, kind: input, shape index: {}]   ;;  %s982_s6 = inlined_call_operand.vmem [shape: f32[1,128], index: 6, kind: input, shape index: {}]   ;;  %s983_s7 = inlined_call_operand.hbm [shape: f32[16,128], index: 7, kind: output, shape index: {}]  }
   0x1   :  { %13 = vsyncpa [#allocation6], 0 }
   0x2   :  { %14 = vsyncpa [#allocation9], 0 }
   0x3   :  { %15 = vsyncpa [#allocation4], 0  ;;  %s818_s24 = smov [#allocation5]   ;;  %s819_s26 = smov [#allocation8]  }
   0x4   :  { %s33_s25 = sshll.u32 %s818_s24, 4  ;;  %s57_s27 = sshll.u32 %s819_s26, 4  ;;  %s34_s25 = int_to_ptr.vmem [resolvable:$true] %s33_s25  ;;  %s866_s27 = int_to_ptr.vmem [resolvable:$true] %s57_s27 }
   0x5   :  { %s678_s30 = scalar_lea.hbm %s977_s1, 256 }
   0x6   :  { %p679_p0 = scmp.ne.s32.totalorder %s977_s1, %s678_s30  ;;  %p682_p1 = scmp.lt.u32.totalorder %s678_s30, %s977_s1 }
   0x8   :  { %p684_p2 = pnand %p682_p1, %p679_p0 }
   0xa   :  { %687 = shalt.err (!%p684_p2)
}
   0xb   :  { %s688_s12 = scalar_lea.vmem %s34_s25, 256  ;;  %p693_p4 = scmp.lt.s32.totalorder %s34_s25, %s34_s25 }
   0xc   :  { %p689_p3 = scmp.ne.s32.totalorder %s34_s25, %s688_s12  ;;  %p694_p5 = scmp.lt.s32.totalorder %s688_s12, %s688_s12 }
   0xe   :  { %p695_p6 = por %p694_p5, %p693_p4 }
  0x10   :  { %p696_p7 = pnand %p695_p6, %p689_p3 }
  0x12   :  { %699 = shalt.err (!%p696_p7)
}
  0x13   :  { %s820_s13 = smov 128   ;;  %s821_s14 = smov 8  }
  0x14   :  { %39 = dma.hbm_to_vmem [thread:$0]  %s977_s1, 256, %s34_s25, [#allocation6], %s820_s13, %s820_s13, %s821_s14  }
  0x15   :  { %s700_s19 = scalar_lea.hbm %s979_s3, 2048 }
  0x16   :  { %p701_p8 = scmp.ne.s32.totalorder %s979_s3, %s700_s19  ;;  %p704_p9 = scmp.lt.u32.totalorder %s700_s19, %s979_s3 }
  0x18   :  { %p706_p10 = pnand %p704_p9, %p701_p8 }
  0x1a   :  { %709 = shalt.err (!%p706_p10)
}
  0x1b   :  { %s710_s24 = scalar_lea.vmem %s866_s27, 2048  ;;  %p715_p12 = scmp.lt.s32.totalorder %s866_s27, %s866_s27 }
  0x1c   :  { %p711_p11 = scmp.ne.s32.totalorder %s866_s27, %s710_s24  ;;  %p716_p13 = scmp.lt.s32.totalorder %s710_s24, %s710_s24 }
  0x1e   :  { %p717_p0 = por %p716_p13, %p715_p12 }
  0x20   :  { %p718_p1 = pnand %p717_p0, %p711_p11 }
  0x22   :  { %721 = shalt.err (!%p718_p1)
}
  0x23   :  { %63 = dma.hbm_to_vmem [thread:$0]  %s979_s3, 2048, %s866_s27, [#allocation9], %s820_s13, %s820_s13, %s821_s14  }
  0x24   :  { %s822_s26 = smov [#allocation2]   ;;  %s823_s29 = smov [#allocation7]  }
  0x25   :  { %s21_s28 = sshll.u32 %s822_s26, 4  ;;  %s45_s30 = sshll.u32 %s823_s29, 4  ;;  %s22_s28 = int_to_ptr.vmem [resolvable:$true] %s21_s28  ;;  %s903_s30 = int_to_ptr.vmem [resolvable:$true] %s45_s30 }
  0x26   :  { %s722_s10 = scalar_lea.hbm %s976_s0, 256 }
  0x27   :  { %p723_p2 = scmp.ne.s32.totalorder %s976_s0, %s722_s10  ;;  %p726_p3 = scmp.lt.u32.totalorder %s722_s10, %s976_s0 }
  0x29   :  { %p728_p4 = pnand %p726_p3, %p723_p2 }
  0x2b   :  { %731 = shalt.err (!%p728_p4)
}
  0x2c   :  { %s732_s3 = scalar_lea.vmem %s22_s28, 256  ;;  %p737_p6 = scmp.lt.s32.totalorder %s22_s28, %s22_s28 }
  0x2d   :  { %p733_p5 = scmp.ne.s32.totalorder %s22_s28, %s732_s3  ;;  %p738_p7 = scmp.lt.s32.totalorder %s732_s3, %s732_s3 }
  0x2f   :  { %p739_p8 = por %p738_p7, %p737_p6 }
  0x31   :  { %p740_p9 = pnand %p739_p8, %p733_p5 }
  0x33   :  { %743 = shalt.err (!%p740_p9)
}
  0x34   :  { %27 = dma.hbm_to_vmem [thread:$0]  %s976_s0, 256, %s22_s28, [#allocation3], %s820_s13, %s820_s13, %s821_s14  }
  0x35   :  { %s744_s20 = scalar_lea.hbm %s978_s2, 2048 }
  0x36   :  { %p745_p10 = scmp.ne.s32.totalorder %s978_s2, %s744_s20  ;;  %p748_p11 = scmp.lt.u32.totalorder %s744_s20, %s978_s2 }
  0x38   :  { %p750_p12 = pnand %p748_p11, %p745_p10 }
  0x3a   :  { %753 = shalt.err (!%p750_p12)
}
  0x3b   :  { %s754_s1 = scalar_lea.vmem %s903_s30, 2048  ;;  %p759_p0 = scmp.lt.s32.totalorder %s903_s30, %s903_s30 }
  0x3c   :  { %p755_p13 = scmp.ne.s32.totalorder %s903_s30, %s754_s1  ;;  %p760_p1 = scmp.lt.s32.totalorder %s754_s1, %s754_s1 }
  0x3e   :  { %p761_p2 = por %p760_p1, %p759_p0 }
  0x40   :  { %p762_p3 = pnand %p761_p2, %p755_p13 }
  0x42   :  { %765 = shalt.err (!%p762_p3)
}
  0x43   :  { %51 = dma.hbm_to_vmem [thread:$0]  %s978_s2, 2048, %s903_s30, [#allocation6], %s820_s13, %s820_s13, %s821_s14  }
  0x44   :  { %s824_s26 = smov [#allocation10]   ;;  %s766_s9 = scalar_lea.hbm %s981_s5, 2048 }
  0x45   :  { %s71_s28 = sshll.u32 %s824_s26, 4  ;;  %p767_p4 = scmp.ne.s32.totalorder %s981_s5, %s766_s9  ;;  %s72_s28 = int_to_ptr.vmem [resolvable:$true] %s71_s28 }
  0x46   :  { %p770_p5 = scmp.lt.u32.totalorder %s766_s9, %s981_s5 }
  0x48   :  { %p772_p6 = pnand %p770_p5, %p767_p4 }
  0x4a   :  { %775 = shalt.err (!%p772_p6)
}
  0x4b   :  { %s776_s16 = scalar_lea.vmem %s72_s28, 2048  ;;  %p781_p8 = scmp.lt.s32.totalorder %s72_s28, %s72_s28 }
  0x4c   :  { %p777_p7 = scmp.ne.s32.totalorder %s72_s28, %s776_s16  ;;  %p782_p9 = scmp.lt.s32.totalorder %s776_s16, %s776_s16 }
  0x4e   :  { %p783_p10 = por %p782_p9, %p781_p8 }
  0x50   :  { %p784_p11 = pnand %p783_p10, %p777_p7 }
  0x52   :  { %787 = shalt.err (!%p784_p11)
}
  0x53   :  { %77 = dma.hbm_to_vmem [thread:$0]  %s981_s5, 2048, %s72_s28, [#allocation9], %s820_s13, %s820_s13, %s821_s14  }
  0x54   :  { %810 = dma.done.wait [#allocation3], 256  }
  0x55   :  { %811 = vsyncadd [#allocation3], 4294967040 }
  0x56   :  { %812 = dma.done.wait [#allocation6], 2304  }
  0x57   :  { %813 = vsyncadd [#allocation6], 4294964992 }
  0x58   :  { %814 = dma.done.wait [#allocation9], 4096  }
  0x59   :  { %815 = vsyncadd [#allocation9], 4294963200  ;;  %v115_v0 = vld [vmem:[#allocation8] sm:$0xff]  ;;  %v116_v1 = vld [vmem:[#allocation8 + $0x8] sm:$0xff]  ;;  %s825_s18 = smov [#allocation11]  }
  0x5a   :  { %v117_v2 = vld [vmem:[#allocation8 + $0x10] sm:$0xff]  ;;  %v572_v3 = vpack.c.bf16 %v116_v1, %v115_v0  ;;  %v118_v4 = vld [vmem:[#allocation8 + $0x18] sm:$0xff]  ;;  %v119_v6 = vld [vmem:[#allocation8 + $0x20] sm:$0xff]  ;;  %s397_s19 = sshll.u32 %s825_s18, 4  ;;  %s398_s19 = int_to_ptr.vmem [resolvable:$true] %s397_s19 }
  0x5b   :  { %v576_v5 = vpack.c.bf16 %v118_v4, %v117_v2  ;;  %v120_v7 = vld [vmem:[#allocation8 + $0x28] sm:$0xff]  ;;  %v113_v9 = vld [vmem:[#allocation5] sm:$0xff]  ;;  %v122_v11 = vld [vmem:[#allocation8 + $0x38] sm:$0xff]  ;;  %p793_p13 = scmp.lt.s32.totalorder %s398_s19, %s398_s19 }
  0x5c   :  { %573 = vmatprep.subr.bf16.mxu0 %v572_v3  ;;  %v580_v8 = vpack.c.bf16 %v120_v7, %v119_v6  ;;  %v121_v10 = vld [vmem:[#allocation8 + $0x30] sm:$0xff]  ;;  %499 = vmatprep.mubr.f32.mxu0 %v113_v9  ;;  %v123_v13 = vld [vmem:[#allocation8 + $0x40] sm:$0xff]  ;;  %v124_v14 = vld [vmem:[#allocation8 + $0x48] sm:$0xff] }
  0x5d   :  { %575 = vmatpush3.bf16.msra.mxu0 %v572_v3  ;;  %v584_v12 = vpack.c.bf16 %v122_v11, %v121_v10  ;;  %v292_v15 = vld [vmem:[#allocation10] sm:$0xff]  ;;  %v293_v16 = vld [vmem:[#allocation10 + $0x8] sm:$0xff]  ;;  %v294_v17 = vld [vmem:[#allocation10 + $0x10] sm:$0xff]  ;;  %v588_v18 = vpack.c.bf16 %v124_v14, %v123_v13 }
  0x5e   :  { %577 = vmatprep.subr.bf16.mxu0 %v576_v5  ;;  %v125_v19 = vld [vmem:[#allocation8 + $0x50] sm:$0xff]  ;;  %v636_v20 = vpack.c.bf16 %v293_v16, %v292_v15  ;;  %v295_v21 = vld [vmem:[#allocation10 + $0x18] sm:$0xff]  ;;  %v296_v24 = vld [vmem:[#allocation10 + $0x20] sm:$0xff] }
  0x5f   :  { %v126_v22 = vld [vmem:[#allocation8 + $0x58] sm:$0xff]  ;;  %v640_v23 = vpack.c.bf16 %v295_v21, %v294_v17  ;;  %v297_v25 = vld [vmem:[#allocation10 + $0x28] sm:$0xff]  ;;  %v127_v27 = vld [vmem:[#allocation8 + $0x60] sm:$0xff] }
  0x60   :  { %637 = vmatprep.subr.bf16.mxu1 %v636_v20  ;;  %v592_v26 = vpack.c.bf16 %v126_v22, %v125_v19  ;;  %v644_v28 = vpack.c.bf16 %v297_v25, %v296_v24  ;;  %v128_v29 = vld [vmem:[#allocation8 + $0x68] sm:$0xff]  ;;  %v298_v30 = vld [vmem:[#allocation10 + $0x30] sm:$0xff]  ;;  %v299_v31 = vld [vmem:[#allocation10 + $0x38] sm:$0xff] }
  0x61   :  { %579 = vmatpush3.bf16.msra.mxu0 %v576_v5  ;;  %639 = vmatpush3.bf16.msra.mxu1 %v636_v20  ;;  %v596_v32 = vpack.c.bf16 %v128_v29, %v127_v27  ;;  %v129_v33 = vld [vmem:[#allocation8 + $0x70] sm:$0xff]  ;;  %v648_v34 = vpack.c.bf16 %v299_v31, %v298_v30  ;;  %v130_v35 = vld [vmem:[#allocation8 + $0x78] sm:$0xff]  ;;  %v300_v36 = vld [vmem:[#allocation10 + $0x40] sm:$0xff] }
  0x62   :  { %581 = vmatprep.subr.bf16.mxu0 %v580_v8  ;;  %641 = vmatprep.subr.bf16.mxu1 %v640_v23  ;;  %v301_v37 = vld [vmem:[#allocation10 + $0x48] sm:$0xff]  ;;  %v600_v38 = vpack.c.bf16 %v130_v35, %v129_v33  ;;  %v97_v39 = vld [vmem:[#allocation7] sm:$0xff]  ;;  %v302_v42 = vld [vmem:[#allocation10 + $0x50] sm:$0xff] }
  0x63   :  { %v652_v40 = vpack.c.bf16 %v301_v37, %v300_v36  ;;  %v98_v41 = vld [vmem:[#allocation7 + $0x8] sm:$0xff]  ;;  %v303_v43 = vld [vmem:[#allocation10 + $0x58] sm:$0xff]  ;;  %v99_v46 = vld [vmem:[#allocation7 + $0x10] sm:$0xff] }
  0x64   :  { %v604_v44 = vpack.c.bf16 %v98_v41, %v97_v39  ;;  %v656_v45 = vpack.c.bf16 %v303_v43, %v302_v42  ;;  %v100_v47 = vld [vmem:[#allocation7 + $0x18] sm:$0xff]  ;;  %v304_v48 = vld [vmem:[#allocation10 + $0x60] sm:$0xff]  ;;  %v305_v49 = vld [vmem:[#allocation10 + $0x68] sm:$0xff] }
  0x65   :  { %583 = vmatpush3.bf16.msra.mxu0 %v580_v8  ;;  %643 = vmatpush3.bf16.msra.mxu1 %v640_v23  ;;  %v114_v50 = vld [vmem:[#allocation5 + $0x8] sm:$0xff]  ;;  %v608_v51 = vpack.c.bf16 %v100_v47, %v99_v46  ;;  %v95_v52 = vld [vmem:[#allocation2] sm:$0xff]  ;;  %v102_v54 = vld [vmem:[#allocation7 + $0x28] sm:$0xff]  ;;  %v660_v55 = vpack.c.bf16 %v305_v49, %v304_v48 }
  0x66   :  { %585 = vmatprep.subr.bf16.mxu0 %v584_v12  ;;  %645 = vmatprep.subr.bf16.mxu1 %v644_v28  ;;  %v101_v53 = vld [vmem:[#allocation7 + $0x20] sm:$0xff]  ;;  %v103_v57 = vld [vmem:[#allocation7 + $0x30] sm:$0xff]  ;;  %v104_v58 = vld [vmem:[#allocation7 + $0x38] sm:$0xff] }
  0x67   :  { %v612_v56 = vpack.c.bf16 %v102_v54, %v101_v53  ;;  %v616_v59 = vpack.c.bf16 %v104_v58, %v103_v57  ;;  %v105_v60 = vld [vmem:[#allocation7 + $0x40] sm:$0xff]  ;;  %v106_v61 = vld [vmem:[#allocation7 + $0x48] sm:$0xff]  ;;  %v107_v63 = vld [vmem:[#allocation7 + $0x50] sm:$0xff] }
  0x68   :  { %v620_v62 = vpack.c.bf16 %v106_v61, %v105_v60  ;;  %v108_v0 = vld [vmem:[#allocation7 + $0x58] sm:$0xff]  ;;  %v109_v2 = vld [vmem:[#allocation7 + $0x60] sm:$0xff]  ;;  %v110_v3 = vld [vmem:[#allocation7 + $0x68] sm:$0xff] }
  0x69   :  { %587 = vmatpush3.bf16.msra.mxu0 %v584_v12  ;;  %647 = vmatpush3.bf16.msra.mxu1 %v644_v28  ;;  %v624_v1 = vpack.c.bf16 %v108_v0, %v107_v63  ;;  %v628_v4 = vpack.c.bf16 %v110_v3, %v109_v2  ;;  %v111_v5 = vld [vmem:[#allocation7 + $0x70] sm:$0xff]  ;;  %v112_v6 = vld [vmem:[#allocation7 + $0x78] sm:$0xff]  ;;  %v96_v8 = vld [vmem:[#allocation2 + $0x8] sm:$0xff] }
  0x6a   :  { %589 = vmatprep.subr.bf16.mxu0 %v588_v18  ;;  %649 = vmatprep.subr.bf16.mxu1 %v648_v34  ;;  %v632_v7 = vpack.c.bf16 %v112_v6, %v111_v5  ;;  %v306_v9 = vld [vmem:[#allocation10 + $0x70] sm:$0xff]  ;;  %v307_v10 = vld [vmem:[#allocation10 + $0x78] sm:$0xff]  ;;  %v411_v12 = vld [vmem:[%s980_s4] ss:$0 sm:$0xff]  ;;  %s788_s4 = scalar_lea.vmem %s398_s19, 256 }
  0x6b   :  { %v664_v11 = vpack.c.bf16 %v307_v10, %v306_v9  ;;  %v412_v19 = vld [vmem:[%s982_s6] ss:$0 sm:$0xff]  ;;  %p789_p12 = scmp.ne.s32.totalorder %s398_s19, %s788_s4  ;;  %p794_p0 = scmp.lt.s32.totalorder %s788_s4, %s788_s4 }
  0x6d   :  { %591 = vmatpush3.bf16.msra.mxu0 %v588_v18  ;;  %651 = vmatpush3.bf16.msra.mxu1 %v648_v34  ;;  %p795_p1 = por %p794_p0, %p793_p13 }
  0x6e   :  { %593 = vmatprep.subr.bf16.mxu0 %v592_v26  ;;  %653 = vmatprep.subr.bf16.mxu1 %v652_v40 }
  0x6f   :  { %p796_p2 = pnand %p795_p1, %p789_p12 }
  0x71   :  { %595 = vmatpush3.bf16.msra.mxu0 %v592_v26  ;;  %655 = vmatpush3.bf16.msra.mxu1 %v652_v40 }
  0x72   :  { %597 = vmatprep.subr.bf16.mxu0 %v596_v32  ;;  %657 = vmatprep.subr.bf16.mxu1 %v656_v45 }
  0x75   :  { %599 = vmatpush3.bf16.msra.mxu0 %v596_v32  ;;  %659 = vmatpush3.bf16.msra.mxu1 %v656_v45 }
  0x76   :  { %601 = vmatprep.subr.bf16.mxu0 %v600_v38  ;;  %661 = vmatprep.subr.bf16.mxu1 %v660_v55 }
  0x79   :  { %603 = vmatpush3.bf16.msra.mxu0 %v600_v38  ;;  %663 = vmatpush3.bf16.msra.mxu1 %v660_v55 }
  0x7a   :  { %605 = vmatprep.subr.bf16.mxu0 %v604_v44  ;;  %665 = vmatprep.subr.bf16.mxu1 %v664_v11 }
  0x7c   :  { %500 = vmatmul.mubr.f32.vlgmr.msra.gmra.mrb[0].mxu0 %v114_v50 }
  0x7d   :  { %607 = vmatpush3.bf16.msra.mxu0 %v604_v44  ;;  %534 = vmatprep.mubr.f32.mxu0 %v95_v52 }
  0x7e   :  { %609 = vmatprep.subr.bf16.mxu0 %v608_v51  ;;  %667 = vmatpush3.bf16.msra.mxu1 %v664_v11 }
  0x81   :  { %611 = vmatpush3.bf16.msra.mxu0 %v608_v51 }
  0x82   :  { %613 = vmatprep.subr.bf16.mxu0 %v612_v56 }
  0x85   :  { %615 = vmatpush3.bf16.msra.mxu0 %v612_v56 }
  0x86   :  { %617 = vmatprep.subr.bf16.mxu0 %v616_v59 }
  0x89   :  { %619 = vmatpush3.bf16.msra.mxu0 %v616_v59 }
  0x8a   :  { %621 = vmatprep.subr.bf16.mxu0 %v620_v62 }
  0x8d   :  { %623 = vmatpush3.bf16.msra.mxu0 %v620_v62 }
  0x8e   :  { %625 = vmatprep.subr.bf16.mxu0 %v624_v1 }
  0x91   :  { %627 = vmatpush3.bf16.msra.mxu0 %v624_v1 }
  0x92   :  { %629 = vmatprep.subr.bf16.mxu0 %v628_v4 }
  0x95   :  { %631 = vmatpush3.bf16.msra.mxu0 %v628_v4 }
  0x96   :  { %633 = vmatprep.subr.bf16.mxu0 %v632_v7 }
  0x99   :  { %635 = vmatpush3.bf16.msra.mxu0 %v632_v7 }
  0x9c   :  { %535 = vmatmul.mubr.f32.vlgmr.msra.gmra.mrb[0].mxu0 %v96_v8 }
 0x16f   :  { %v536_v13 = vpop.f32.mrb[0].mxu0 }
 0x170   :  { %v289_v14 = vadd.f32 %v536_v13, %v411_v12  ;;  %v272_v15 = vpop.f32.mrb[1].mxu0 }
 0x171   :  { %v288_v16 = vadd.f32 %v411_v12, %v272_v15 }
 0x172   :  { %v291_v18 = vmax.f32 %v289_v14, 0.0 }
 0x173   :  { %v290_v17 = vmax.f32 %v288_v16, 0.0 }
 0x175   :  { %569 = vmatprep.mubr.f32.mxu1 %v290_v17 }
 0x176   :  { %570 = vmatmul.mubr.f32.vlgmr.msra.gmra.mrb[0].mxu1 %v291_v18 }
 0x249   :  { %v571_v20 = vpop.f32.mrb[0].mxu1 }
 0x24a   :  { %v387_v21 = vadd.f32 %v571_v20, %v412_v19  ;;  %v381_v22 = vpop.f32.mrb[1].mxu1 }
 0x24b   :  { %v382_v23 = vadd.f32 %v412_v19, %v381_v22 }
 0x24c   :  { %391 = vst [vmem:[#allocation11 + $0x8] sm:$0xff] %v387_v21 }
 0x24d   :  { %390 = vst [vmem:[#allocation11] sm:$0xff] %v382_v23 }
 0x24e   :  { %799 = shalt.err (!%p796_p2)
}
 0x24f   :  { %s800_s6 = scalar_lea.hbm %s983_s7, 256 }
 0x250   :  { %p801_p3 = scmp.ne.s32.totalorder %s983_s7, %s800_s6  ;;  %p804_p4 = scmp.lt.u32.totalorder %s800_s6, %s983_s7 }
 0x252   :  { %p806_p5 = pnand %p804_p4, %p801_p3 }
 0x254   :  { %809 = shalt.err (!%p806_p5)
}
 0x255   :  { %403 = dma.vmem_to_hbm [thread:$0]  %s398_s19, 256, %s983_s7, [#allocation4], %s820_s13, %s820_s13, %s821_s14  }
 0x256   :  { %816 = dma.done.wait [#allocation4], 256  }
 0x257   :  { %817 = vsyncadd [#allocation4], 4294967040 }
 0x258   :  { %407 = vsyncpa [#allocation3], 1 }
 0x259   :  { %408 = vsyncpa [#allocation6], 1 }
 0x25a   :  { %409 = vsyncpa [#allocation9], 1 }
 0x25b   :  { %410 = vsyncpa [#allocation4], 1 }

</bundles_post_ra>
